<compile_context>
chip_gen: v6e
topology: v6e:2x2x1
jax: 0.10.0
libtpu: 0.0.40
codegen_flags: <defaults>
</compile_context>

<pallas_src>
import numpy as np

import jax
import jax.numpy as jnp
from jax.experimental import pallas as pl
from jax.experimental.pallas import tpu as pltpu


def _decoder_kernel(x_ref, w_ref, b_ref, o_ref):
    """One (batch, pixel-tile) step of the fused per-head affine map.

    x_ref : (1, T, C, tile_hw) VMEM  activations, pixels on lanes
    w_ref : (1, C, C)          VMEM  fused weights, w_ref[0, co, ci] = W_eff[ci, co]
    b_ref : (1, C, 1)          VMEM  fused bias
    o_ref : (1, T, C, tile_hw) VMEM
    """
    C = w_ref.shape[1]
    wt = w_ref[0]                                   # (C, C)  [co, ci]
    bv = b_ref[0]                                   # (C, 1)

    # Load each input-channel plane once, broadcast it across the C output
    # channels (sublane broadcast) and FMA against the lane-broadcast weight
    # column.  Everything stays full-width; a single dense store at the end.
    acc = x_ref[0, :, 0:1, :].astype(jnp.float32) * wt[:, 0:1]      # (T, C, tile)
    for ci in range(1, C):
        acc = acc + x_ref[0, :, ci:ci + 1, :].astype(jnp.float32) * wt[:, ci:ci + 1]
    acc = acc + bv
    o_ref[0] = acc.astype(o_ref.dtype)              # one full-block store


def fuse_head_params(params):
    """Fold the all-linear head (1x1 convs, no nonlinearity) into one affine
    map per head:  y = x @ W_eff[h] + b_eff[h].  Done in float64 on the host
    so the fusion itself adds no fp32 rounding error."""
    w1, b1, wm, bm, wl, bl = [np.asarray(p, dtype=np.float64) for p in params]
    n_heads = w1.shape[0]
    n_mid = wm.shape[1]
    w_list, b_list = [], []
    for h in range(n_heads):
        Wc = w1[h]                       # (C, hidden)
        bc = b1[h]                       # (1, hidden)
        for l in range(n_mid):
            bc = bc @ wm[h, l] + bm[h, l]
            Wc = Wc @ wm[h, l]
        bc = bc @ wl[h] + bl[h]          # (1, C)
        Wc = Wc @ wl[h]                  # (C, C)
        w_list.append(Wc)
        b_list.append(bc[0])
    return np.stack(w_list, 0), np.stack(b_list, 0)   # f64 (n_heads,C,C), (n_heads,C)


def _choose_tile_hw(HW, T, C, itemsize, vmem_block_budget_bytes, min_tiles=1):
    """Largest pixel tile whose double-buffered in+out footprint
    (4 * T * C * tile * itemsize) fits the budget, divides H*W, is lane-dense
    (multiple of 128) where possible, and yields >= min_tiles grid steps."""
    bytes_per_px = 4 * T * C * itemsize              # 2 buffers x (input + output)
    cap = max(128, vmem_block_budget_bytes // bytes_per_px)
    if min_tiles > 1:
        cap = min(cap, max(128, HW // min_tiles))
    if HW <= cap and min_tiles <= 1:
        return HW
    best = 0
    t = 128
    while t <= min(cap, HW):                         # largest 128-multiple divisor <= cap
        if HW % t == 0:
            best = t
        t += 128
    if best:
        return best
    for t in range(128, HW, 128):                    # smallest lane-aligned divisor
        if HW % t == 0:
            return t
    return HW                                        # no 128-multiple divisor exists


def multihead_decoder_forward(x, head_nums, params, *, tile_hw=None,
                              vmem_block_budget_bytes=2 << 20,
                              min_pallas_bytes=1 << 18):
    """x: [B, T, C, H, W] float32; head_nums: [B] int32; returns [B, T, C, H, W]."""
    B, T, C, H, W = x.shape
    HW = H * W
    itemsize = jnp.dtype(x.dtype).itemsize

    # Host-side exact fusion of the linear 1x1-conv chain, gathered per batch.
    w_eff, b_eff = fuse_head_params(params)
    w_all = jnp.asarray(np.transpose(w_eff, (0, 2, 1)), jnp.float32)  # [h, co, ci]
    b_all = jnp.asarray(b_eff, jnp.float32)                            # [h, co]
    w_g = w_all[head_nums]                                             # (B, C, C)
    b_g = b_all[head_nums][:, :, None]                                 # (B, C, 1)

    # Pixels-last lane-dense view: pure reshape, no HBM transpose.
    x_r = x.reshape(B, T, C, HW)

    # Tiny problems: pipeline/launch overhead dominates -> fused einsum instead.
    if B * T * C * HW * itemsize < min_pallas_bytes:
        y = jnp.einsum("btip,boi->btop", x_r, w_g) + b_g[:, None]
        return y.astype(x.dtype).reshape(B, T, C, H, W)

    if tile_hw is None:
        tile_hw = _choose_tile_hw(HW, T, C, itemsize,
                                  vmem_block_budget_bytes=vmem_block_budget_bytes,
                                  min_tiles=2 if B < 2 else 1)
    assert HW % tile_hw == 0, "H*W must be divisible by tile_hw"
    n_tiles = HW // tile_hw

    # Double-buffered in+out block footprint must fit scoped VMEM with headroom.
    blk_bytes = 4 * T * C * tile_hw * itemsize
    assert blk_bytes <= (24 << 20), (
        f"pixel tile {tile_hw} needs ~{blk_bytes} B of VMEM; pad H*W to a "
        f"multiple of 128 or pass a smaller tile_hw explicitly")

    out = pl.pallas_call(
        _decoder_kernel,
        out_shape=jax.ShapeDtypeStruct((B, T, C, HW), x.dtype),
        grid=(B, n_tiles),
        in_specs=[
            pl.BlockSpec((1, T, C, tile_hw), lambda b, n: (b, 0, 0, n)),
            pl.BlockSpec((1, C, C), lambda b, n: (b, 0, 0)),   # fused weights
            pl.BlockSpec((1, C, 1), lambda b, n: (b, 0, 0)),   # fused bias
        ],
        out_specs=pl.BlockSpec((1, T, C, tile_hw), lambda b, n: (b, 0, 0, n)),
        compiler_params=pltpu.CompilerParams(
            dimension_semantics=("parallel", "parallel")),
        cost_estimate=pl.CostEstimate(
            flops=2 * B * T * HW * C * C,
            transcendentals=0,
            bytes_accessed=2 * B * T * C * HW * itemsize),
    )(x_r, w_g, b_g)
    return out.reshape(B, T, C, H, W)


def init_params(key, n_heads, num_output_vars, hidden_dim, n_layers):
    """Deterministic synthetic weights. 1x1 Conv2d(out,in,1,1) stored as [in,out]
    matrices (already transposed for x @ W)."""
    assert n_layers >= 2, "this implementation expects at least one hidden conv"
    n_mid = n_layers - 1
    k = jax.random.split(key, 6)
    scale = 0.1
    w1 = scale * jax.random.normal(k[0], (n_heads, num_output_vars, hidden_dim), jnp.float32)
    b1 = scale * jax.random.normal(k[1], (n_heads, 1, hidden_dim), jnp.float32)
    wm = scale * jax.random.normal(k[2], (n_heads, n_mid, hidden_dim, hidden_dim), jnp.float32)
    bm = scale * jax.random.normal(k[3], (n_heads, n_mid, 1, hidden_dim), jnp.float32)
    wl = scale * jax.random.normal(k[4], (n_heads, hidden_dim, num_output_vars), jnp.float32)
    bl = scale * jax.random.normal(k[5], (n_heads, 1, num_output_vars), jnp.float32)
    return (w1, b1, wm, bm, wl, bl)


def reference_forward(x, head_nums, params):
    """Pure-JAX reference mirroring the PyTorch forward (per-sample head),
    deliberately UN-fused so it also validates the weight-fusion algebra."""
    w1, b1, wm, bm, wl, bl = params
    B, T, C, H, W = x.shape
    n_mid = wm.shape[1]
    outs = []
    for i in range(B):
        h = int(head_nums[i])
        z = jnp.transpose(x[i], (0, 2, 3, 1)).reshape(-1, C)   # (T*H*W, C)
        z = z @ w1[h] + b1[h]
        for l in range(n_mid):
            z = z @ wm[h, l] + bm[h, l]
        z = z @ wl[h] + bl[h]
        outs.append(jnp.transpose(z.reshape(T, H, W, C), (0, 3, 1, 2)))
    return jnp.stack(outs, axis=0)


if __name__ == "__main__":
    # Module configuration (mirrors MultiHeadDecoder.__init__)
    in_var_ids = ["v0", "v1", "v2", "v3"]
    out_var_ids = ["o0", "o1", "o2", "o3"]          # num_output_vars = 4
    train_models = ["modelA", "modelB", "modelC"]   # n_heads = 3
    n_layers = 3                                    # -> 2 hidden 1x1 convs
    hidden_dim = 32
    num_output_vars = len(out_var_ids)
    model_name_to_head_num = {m: i for i, m in enumerate(train_models)}

    # Small example input: [B, T, C_out, H, W]
    B, T, H, W = 2, 2, 16, 16
    key = jax.random.PRNGKey(0)
    kx, kp = jax.random.split(key)
    x = jax.random.normal(kx, (B, T, num_output_vars, H, W), jnp.float32)

    # Per-sample model ids -> head indices (forward's head_nums tensor).
    # TODO(synk): the string->head lookup and set_active_heads (requires_grad
    # bookkeeping) are host-side / training-only and have no kernel equivalent.
    model_ids = ["modelB", "modelA"]
    head_nums = jnp.array([model_name_to_head_num[m] for m in model_ids], jnp.int32)

    params = init_params(kp, len(train_models), num_output_vars, hidden_dim, n_layers)

    # min_pallas_bytes=0 forces the Pallas path even at this tiny demo size
    # (production callers keep the default, which routes tiny problems to einsum).
    y = multihead_decoder_forward(x, head_nums, params, min_pallas_bytes=0)
    y = jax.block_until_ready(y)

    y_ref = reference_forward(x, head_nums, params)
    assert y.shape == (B, T, num_output_vars, H, W)
    assert jnp.allclose(y, y_ref, atol=1e-4, rtol=1e-4), "mismatch vs reference"

    print("KERNEL_OK")
</pallas_src>

<mosaic_0001>
module attributes {stable_mosaic.version = 11 : i64} {
  func.func @_decoder_kernel(%arg0: i32, %arg1: i32, %arg2: memref<1x2x4x256xf32, #tpu.memory_space<vmem>>, %arg3: memref<1x4x4xf32, #tpu.memory_space<vmem>>, %arg4: memref<1x4x1xf32, #tpu.memory_space<vmem>>, %arg5: memref<1x2x4x256xf32, #tpu.memory_space<vmem>>) attributes {dimension_semantics = [#tpu.dimension_semantics<parallel>, #tpu.dimension_semantics<parallel>], iteration_bounds = array<i64: 2, 1>, scalar_prefetch = 0 : i64, scratch_operands = 0 : i64, tpu.core_type = #tpu.core_type<tc>, window_params = [{transform_indices = @transform_0, window_bounds = array<i64: 1, 2, 4, 256>}, {transform_indices = @transform_1, window_bounds = array<i64: 1, 4, 4>}, {transform_indices = @transform_2, window_bounds = array<i64: 1, 4, 1>}, {transform_indices = @transform_3, window_bounds = array<i64: 1, 2, 4, 256>}]} {
    %c0 = arith.constant 0 : index
    %c0_0 = arith.constant 0 : index
    %c0_1 = arith.constant 0 : index
    %0 = vector.load %arg3[%c0, %c0_0, %c0_1] : memref<1x4x4xf32, #tpu.memory_space<vmem>>, vector<1x4x4xf32>
    %1 = vector.shape_cast %0 : vector<1x4x4xf32> to vector<4x4xf32>
    %c0_2 = arith.constant 0 : index
    %c0_3 = arith.constant 0 : index
    %c0_4 = arith.constant 0 : index
    %2 = vector.load %arg4[%c0_2, %c0_3, %c0_4] : memref<1x4x1xf32, #tpu.memory_space<vmem>>, vector<1x4x1xf32>
    %3 = vector.shape_cast %2 : vector<1x4x1xf32> to vector<4x1xf32>
    %c0_5 = arith.constant 0 : index
    %c0_6 = arith.constant 0 : index
    %c0_7 = arith.constant 0 : index
    %c0_8 = arith.constant 0 : index
    %4 = vector.load %arg2[%c0_5, %c0_6, %c0_7, %c0_8] : memref<1x2x4x256xf32, #tpu.memory_space<vmem>>, vector<1x2x1x256xf32>
    %5 = vector.shape_cast %4 : vector<1x2x1x256xf32> to vector<2x1x256xf32>
    %6 = vector.extract_strided_slice %1 {offsets = [0, 0], sizes = [4, 1], strides = [1, 1]} : vector<4x4xf32> to vector<4x1xf32>
    %7 = vector.shape_cast %6 : vector<4x1xf32> to vector<1x4x1xf32>
    %8 = vector.broadcast %5 : vector<2x1x256xf32> to vector<2x4x256xf32>
    %9 = vector.broadcast %7 : vector<1x4x1xf32> to vector<2x4x256xf32>
    %10 = arith.mulf %8, %9 : vector<2x4x256xf32>
    %c0_9 = arith.constant 0 : index
    %c0_10 = arith.constant 0 : index
    %c1 = arith.constant 1 : index
    %c0_11 = arith.constant 0 : index
    %11 = vector.load %arg2[%c0_9, %c0_10, %c1, %c0_11] : memref<1x2x4x256xf32, #tpu.memory_space<vmem>>, vector<1x2x1x256xf32>
    %12 = vector.shape_cast %11 : vector<1x2x1x256xf32> to vector<2x1x256xf32>
    %13 = vector.extract_strided_slice %1 {offsets = [0, 1], sizes = [4, 1], strides = [1, 1]} : vector<4x4xf32> to vector<4x1xf32>
    %14 = vector.shape_cast %13 : vector<4x1xf32> to vector<1x4x1xf32>
    %15 = vector.broadcast %12 : vector<2x1x256xf32> to vector<2x4x256xf32>
    %16 = vector.broadcast %14 : vector<1x4x1xf32> to vector<2x4x256xf32>
    %17 = arith.mulf %15, %16 : vector<2x4x256xf32>
    %18 = arith.addf %10, %17 : vector<2x4x256xf32>
    %c0_12 = arith.constant 0 : index
    %c0_13 = arith.constant 0 : index
    %c2 = arith.constant 2 : index
    %c0_14 = arith.constant 0 : index
    %19 = vector.load %arg2[%c0_12, %c0_13, %c2, %c0_14] : memref<1x2x4x256xf32, #tpu.memory_space<vmem>>, vector<1x2x1x256xf32>
    %20 = vector.shape_cast %19 : vector<1x2x1x256xf32> to vector<2x1x256xf32>
    %21 = vector.extract_strided_slice %1 {offsets = [0, 2], sizes = [4, 1], strides = [1, 1]} : vector<4x4xf32> to vector<4x1xf32>
    %22 = vector.shape_cast %21 : vector<4x1xf32> to vector<1x4x1xf32>
    %23 = vector.broadcast %20 : vector<2x1x256xf32> to vector<2x4x256xf32>
    %24 = vector.broadcast %22 : vector<1x4x1xf32> to vector<2x4x256xf32>
    %25 = arith.mulf %23, %24 : vector<2x4x256xf32>
    %26 = arith.addf %18, %25 : vector<2x4x256xf32>
    %c0_15 = arith.constant 0 : index
    %c0_16 = arith.constant 0 : index
    %c3 = arith.constant 3 : index
    %c0_17 = arith.constant 0 : index
    %27 = vector.load %arg2[%c0_15, %c0_16, %c3, %c0_17] : memref<1x2x4x256xf32, #tpu.memory_space<vmem>>, vector<1x2x1x256xf32>
    %28 = vector.shape_cast %27 : vector<1x2x1x256xf32> to vector<2x1x256xf32>
    %29 = vector.extract_strided_slice %1 {offsets = [0, 3], sizes = [4, 1], strides = [1, 1]} : vector<4x4xf32> to vector<4x1xf32>
    %30 = vector.shape_cast %29 : vector<4x1xf32> to vector<1x4x1xf32>
    %31 = vector.broadcast %28 : vector<2x1x256xf32> to vector<2x4x256xf32>
    %32 = vector.broadcast %30 : vector<1x4x1xf32> to vector<2x4x256xf32>
    %33 = arith.mulf %31, %32 : vector<2x4x256xf32>
    %34 = arith.addf %26, %33 : vector<2x4x256xf32>
    %35 = vector.shape_cast %3 : vector<4x1xf32> to vector<1x4x1xf32>
    %36 = vector.broadcast %35 : vector<1x4x1xf32> to vector<2x4x256xf32>
    %37 = arith.addf %34, %36 : vector<2x4x256xf32>
    %c0_18 = arith.constant 0 : index
    %c0_19 = arith.constant 0 : index
    %c0_20 = arith.constant 0 : index
    %c0_21 = arith.constant 0 : index
    %38 = vector.load %arg5[%c0_18, %c0_19, %c0_20, %c0_21] : memref<1x2x4x256xf32, #tpu.memory_space<vmem>>, vector<1x2x4x256xf32>
    %39 = vector.shape_cast %38 : vector<1x2x4x256xf32> to vector<2x4x256xf32>
    %40 = vector.shape_cast %37 : vector<2x4x256xf32> to vector<1x2x4x256xf32>
    tpu.vector_store %arg5[%c0_18, %c0_19, %c0_20, %c0_21], %40 {strides = array<i32>} : memref<1x2x4x256xf32, #tpu.memory_space<vmem>>, vector<1x2x4x256xf32>,
    return
  }
  func.func @transform_0(%arg0: i32, %arg1: i32) -> (i32, i32, i32, i32) {
    %c0_i32 = arith.constant 0 : i32
    %c0_i32_0 = arith.constant 0 : i32
    %c0_i32_1 = arith.constant 0 : i32
    return %arg0, %c0_i32, %c0_i32_0, %arg1 : i32, i32, i32, i32
  }
  func.func @transform_1(%arg0: i32, %arg1: i32) -> (i32, i32, i32) {
    %c0_i32 = arith.constant 0 : i32
    %c0_i32_0 = arith.constant 0 : i32
    %c0_i32_1 = arith.constant 0 : i32
    return %arg0, %c0_i32, %c0_i32_0 : i32, i32, i32
  }
  func.func @transform_2(%arg0: i32, %arg1: i32) -> (i32, i32, i32) {
    %c0_i32 = arith.constant 0 : i32
    %c0_i32_0 = arith.constant 0 : i32
    %c0_i32_1 = arith.constant 0 : i32
    return %arg0, %c0_i32, %c0_i32_0 : i32, i32, i32
  }
  func.func @transform_3(%arg0: i32, %arg1: i32) -> (i32, i32, i32, i32) {
    %c0_i32 = arith.constant 0 : i32
    %c0_i32_0 = arith.constant 0 : i32
    %c0_i32_1 = arith.constant 0 : i32
    return %arg0, %c0_i32, %c0_i32_0, %arg1 : i32, i32, i32, i32
  }
}

</mosaic_0001>

<bundles_post_ra>
// kernel: tpu_custom_call.1
= control target key start
LH: loop header
LB: loop body
LE: loop exit
PB: predicated region body
PF: predicated region fallthrough
CT: control target
= control target key end

     0   :  { %8 = vsyncpa [#allocation3], 0  ;;  %s949_s0 = inlined_call_operand.hbm [shape: f32[2,2,4,256], index: 0, kind: input, shape index: {}]   ;;  %s950_s1 = inlined_call_operand.vmem [shape: f32[2,4,4], index: 1, kind: input, shape index: {}]   ;;  %s951_s2 = inlined_call_operand.vmem [shape: f32[2,4,1], index: 2, kind: input, shape index: {}]   ;;  %s952_s3 = inlined_call_operand.hbm [shape: f32[2,2,4,256], index: 3, kind: output, shape index: {}]  }
   0x1   :  { %10 = vsyncpa [#allocation3 + $0x1], 0 }
   0x2   :  { %11 = vsyncpa [#allocation4], 0 }
   0x3   :  { %13 = vsyncpa [#allocation4 + $0x1], 0  ;;  %s781_s12 = smov 0   ;;  %s783_s13 = smov 0  }
   0x4   :  { %s785_s14 = smov 0   ;;  %s787_s15 = smov 0  }
   0x5   :  { %s789_s16 = smov 0   ;;  %s791_s17 = smov 0  }
   0x6 LB: > { %s539_s18 = sadd.s32 4294967295, %s749_s17   ;;  %s540_s19 = sadd.s32 4294967294, %s749_s17   ;;  %s749_s17 = sphi %s791_s17, %s19_s17   ;;  %s745_s16 = sphi %s789_s16, %s963_s16   ;;  %s741_s15 = sphi %s787_s15, %s962_s15   ;;  %s737_s14 = sphi %s785_s14, %s961_s14   ;;  %s733_s13 = sphi %s783_s13, %s960_s13   ;;  %s729_s12 = sphi %s781_s12, %s959_s12  }
   0x7   : > { %s31_s20 = sadd.s32 1, %s745_s16  ;;  %s40_s21 = sadd.s32 1, %s737_s14 }
   0x8   : > { %p33_p0 = scmp.ge.s32.totalorder %s31_s20, 2  ;;  %p47_p1 = scmp.ne.s32.totalorder %s737_s14, %s733_s13 }
   0x9   : > { %p48_p2 = scmp.eq.s32.totalorder %s749_s17, 0  ;;  %p53_p3 = scmp.ne.s32.totalorder %s733_s13, %s729_s12 }
   0xa   : > { %s965_s20 = smov (%p33_p0, %s31_s20), 0  ;;  %p54_p5 = scmp.eq.s32.totalorder %s539_s18, 0 }
   0xb   : > { %p822_p4 = por %p48_p2, %p47_p1  ;;  %s35_s23 = ssub.s32 %s745_s16, %s965_s20 }
   0xc   : > { %p131_p6 = scmp.eq.s32.totalorder %s539_s18, 1  ;;  %p38_p7 = scmp.eq.s32.totalorder %s35_s23, 0 }
   0xd   : > { %p828_p8 = por %p54_p5, %p53_p3  ;;  %p137_p10 = scmp.eq.s32.totalorder %s540_s19, 1 }
   0xe   : > { %p832_p9 = por %p131_p6, %p47_p1  ;;  %p577_p13 = scmp.lt.s32.totalorder %s749_s17, 2 }
   0xf   : > { %s837_s26 = scalar_select %p38_p7, %s737_s14, %s40_s21  }
  0x10   : > { %p839_p11 = por %p137_p10, %p53_p3  ;;  %s157_s28 = sand.u32 1, %s737_s14  }
  0x11   : > { %s543_s29 = sshll.u32 %s157_s28, 4  ;;  %s563_s30 = sshll.u32 %s745_s16, 8 }
  0x12   : > { %s169_s6 = scalar_lea.hbm %s949_s0, %s563_s30  ;;  %s161_s7 = scalar_lea.vmem [#allocation2], %s543_s29 }
  0x13   : > { %s170_s8 = sshll.u32 %s161_s7, 4  ;;  %p852_p0 = pnand %p577_p13, %p822_p4  ;;  %s171_s8 = int_to_ptr.vmem [resolvable:$true] %s170_s8 }
  0x14   : > { %p546_p1 = scmp.ge.s32.totalorder %s749_s17, 1  ;;  %s158_s10 = scalar_lea.sflag [#allocation3], %s157_s28 }
  0x15   : > { %p643_p2 = pneg %p852_p0  ;;  %s654_s11 = scalar_lea.vmem %s171_s8, 256 }
  0x16   : > { %p655_p3 = scmp.ne.s32.totalorder %s171_s8, %s654_s11  ;;  %s751_s18 = smov [#allocation2]  }
  0x17   : > { %s659_s19 = sshll.u32 %s751_s18, 4  ;;  %s660_s19 = int_to_ptr.vmem [resolvable:$false] %s659_s19 }
  0x18   : > { %p657_p5 = pnand %p655_p3, %p643_p2  ;;  %s661_s21 = scalar_lea.vmem %s660_s19, 512 }
  0x19   : > { %p662_p7 = scmp.lt.s32.totalorder %s171_s8, %s660_s19  ;;  %p663_p10 = scmp.lt.s32.totalorder %s661_s21, %s654_s11 }
  0x1a   : > { %p658_p6 = pneg %p657_p5 }
  0x1b   : > { %p664_p12 = por %p663_p10, %p662_p7 }
  0x1d   : > { %p665_p4 = pnand %p664_p12, %p658_p6 }
  0x1f   : > { %668 = shalt.err (!%p665_p4)
}
  0x20   : > { %s752_s22 = smov 128   ;;  %s753_s23 = smov 8  }
  0x21   : > { %572 = dma.hbm_to_vmem [thread:$0]  (!%p852_p0), %s169_s6, 256, %s171_s8, %s158_s10, %s752_s22, %s752_s22, %s753_s23  }
  0x22   : > { %p192_p13 = scmp.lt.s32.totalorder %s749_s17, 3 }
  0x24   : > { %p193_p2 = pnand %p546_p1, %p192_p13 }
  0x25   : > { %s865_s28 = sand.u32 (!%p193_p2), 1, %s733_s13  }
  0x26   : > { %196 = sbr.rel (%p193_p2) target bundleno = 206 (0xce), region = 32  ;;  %s547_s29 = sshll.u32 (!%p193_p2), %s865_s28, 4 }
  0x27   : > { %s199_s30 = scalar_lea.sflag (!%p193_p2), [#allocation3], %s865_s28  ;;  %s871_s4 = scalar_lea.vmem (!%p193_p2), [#allocation2], %s547_s29 }
  0x2b   : > { %720 = dma.done.wait (%p828_p8), %s199_s30, 256  }
  0x2c   : > { %722 = vsyncadd (%p828_p8), %s199_s30, 4294967040  ;;  %p234_p12 = scmp.lt.s32.totalorder %s741_s15, 1  ;;  %v754_v0 = vmov 0   ;;  %v755_v1 = vmov 2   ;;  %v756_v3 = vmov 1   ;;  %v757_v4 = vmov 3  }
  0x2d   : > { %635 = vset.pattern.permute.xlu0 %v754_v0  ;;  %637 = vset.pattern.permute.xlu1 %v755_v1  ;;  %v250_v6 = vlaneseq  ;;  %v245_v10 = vld [vmem:[%s871_s4] ss:$4 sm:$0x3]  ;;  %v551_v11 = vld [vmem:[%s871_s4 + $0x8] ss:$4 sm:$0x3] }
  0x2e   : > { %s235_s5 = scalar_select %p234_p12, %s741_s15, 1  ;;  %v554_v12 = vld [vmem:[%s871_s4 + $0x2] ss:$4 sm:$0x3] }
  0x2f   : > { %v251_v7 = vshrl.u32 %v250_v6, 7  ;;  %v555_v13 = vld [vmem:[%s871_s4 + $0xa] ss:$4 sm:$0x3]  ;;  %s232_s18 = scalar_lea.vmem [#allocation5], %s547_s29  ;;  %s564_s21 = sshll.u32 %s741_s15, 8 }
  0x30   : > { %s549_s6 = sshll.u32 %s235_s5, 2  ;;  %v552_v14 = vld [vmem:[%s871_s4 + $0x1] ss:$4 sm:$0x3]  ;;  %s428_s19 = sshll.u32 %s232_s18, 4  ;;  %s896_s19 = int_to_ptr.vmem [resolvable:$true] %s428_s19 }
  0x31   : > { %s237_s9 = scalar_lea.vmem %s950_s1, %s549_s6  ;;  %s241_s11 = scalar_lea.vmem %s951_s2, %s549_s6  ;;  %v252_v8 = vsub.s32 0, %v251_v7  ;;  %v256_v9 = vsub.s32 1, %v251_v7  ;;  %v553_v15 = vld [vmem:[%s871_s4 + $0x9] ss:$4 sm:$0x3] }
  0x32   : > { %v243_v2 = vld [vmem:[%s237_s9] sm:$0xf]  ;;  %v557_v23 = vld [vmem:[%s871_s4 + $0xb] ss:$4 sm:$0x3]  ;;  %s901_s29 = scalar_lea.hbm %s952_s3, %s564_s21  ;;  %s413_s30 = scalar_lea.sflag [#allocation4], %s865_s28 }
  0x33   : > { %272 = vperm.xlu0 %635, %v243_v2   ;;  %344 = vperm.xlu1 %637, %v243_v2   ;;  %v244_v5 = vld [vmem:[%s241_s11] sm:$0xf]  ;;  %v253_v16 = vrot.slane %v245_v10, %v252_v8  ;;  %v257_v17 = vrot.slane %v245_v10, %v256_v9  ;;  %v261_v18 = vrot.slane %v551_v11, %v252_v8  ;;  %s669_s15 = scalar_lea.vmem %s896_s19, 256 }
  0x34   : > { %v265_v19 = vrot.slane %v551_v11, %v256_v9  ;;  %v556_v22 = vld [vmem:[%s871_s4 + $0x3] ss:$4 sm:$0x3]  ;;  %v326_v24 = vrot.slane %v554_v12, %v252_v8  ;;  %v330_v25 = vrot.slane %v554_v12, %v256_v9  ;;  %v334_v26 = vrot.slane %v555_v13, %v252_v8  ;;  %p670_p8 = scmp.ne.s32.totalorder %s896_s19, %s669_s15  ;;  %s758_s4 = smov [#allocation5]  }
  0x35   : > { %v338_v27 = vrot.slane %v555_v13, %v256_v9  ;;  %v288_v28 = vrot.slane %v552_v14, %v252_v8  ;;  %v292_v29 = vrot.slane %v552_v14, %v256_v9  ;;  %v296_v30 = vrot.slane %v553_v15, %v252_v8  ;;  %s673_s5 = sshll.u32 %s758_s4, 4  ;;  %s674_s5 = int_to_ptr.vmem [resolvable:$false] %s673_s5 }
  0x36   : > { %v300_v31 = vrot.slane %v553_v15, %v256_v9  ;;  %v364_v32 = vrot.slane %v556_v22, %v252_v8  ;;  %v368_v33 = vrot.slane %v556_v22, %v256_v9  ;;  %v372_v34 = vrot.slane %v557_v23, %v252_v8  ;;  %p671_p0 = pnand %p670_p8, %p832_p9  ;;  %s675_s6 = scalar_lea.vmem %s674_s5, 512 }
  0x37   : > { %636 = vset.pattern.permute.xlu0 %v756_v3  ;;  %638 = vset.pattern.permute.xlu1 %v757_v4  ;;  %v376_v35 = vrot.slane %v557_v23, %v256_v9  ;;  %p676_p3 = scmp.lt.s32.totalorder %s896_s19, %s674_s5  ;;  %p677_p5 = scmp.lt.s32.totalorder %s675_s6, %s669_s15 }
  0x38   : > { %306 = vperm.xlu0 %636, %v243_v2   ;;  %382 = vperm.xlu1 %638, %v243_v2   ;;  %p672_p1 = pneg %p671_p0 }
  0x39   : > { %p678_p6 = por %p677_p5, %p676_p3 }
  0x3b   : > { %p679_p7 = pnand %p678_p6, %p672_p1 }
  0x3c   : > { %639 = vset.pattern.permute.xlu1 %v754_v0  ;;  %640 = vset.pattern.permute.xlu0 %v754_v0 }
  0x3d   : > { %395 = vperm.xlu1 %639, %v244_v5  }
  0xae   : > { %v273_v20 = vpop.permute.xlu0 %272  ;;  %v345_v21 = vpop.permute.xlu1 %344 }
  0xaf   : > { %v275_v36 = vmul.f32 %v273_v20, %v253_v16  ;;  %v276_v37 = vmul.f32 %v273_v20, %v257_v17  ;;  %v277_v38 = vmul.f32 %v273_v20, %v261_v18  ;;  %v278_v39 = vmul.f32 %v273_v20, %v265_v19 }
  0xb0   : > { %v347_v40 = vmul.f32 %v345_v21, %v326_v24  ;;  %v348_v41 = vmul.f32 %v345_v21, %v330_v25  ;;  %v349_v42 = vmul.f32 %v345_v21, %v334_v26  ;;  %v350_v43 = vmul.f32 %v345_v21, %v338_v27 }
  0xb3   : > { %v307_v44 = vpop.permute.xlu0 %306  ;;  %v383_v45 = vpop.permute.xlu1 %382 }
  0xb4   : > { %v309_v46 = vmul.f32 %v307_v44, %v288_v28  ;;  %v310_v47 = vmul.f32 %v307_v44, %v292_v29  ;;  %v311_v48 = vmul.f32 %v307_v44, %v296_v30  ;;  %v312_v49 = vmul.f32 %v307_v44, %v300_v31 }
  0xb5   : > { %v385_v50 = vmul.f32 %v383_v45, %v364_v32  ;;  %v386_v51 = vmul.f32 %v383_v45, %v368_v33  ;;  %v387_v52 = vmul.f32 %v383_v45, %v372_v34  ;;  %v388_v53 = vmul.f32 %v383_v45, %v376_v35 }
  0xb6   : > { %v313_v54 = vadd.f32 %v309_v46, %v275_v36  ;;  %v314_v55 = vadd.f32 %v310_v47, %v276_v37  ;;  %v315_v56 = vadd.f32 %v311_v48, %v277_v38  ;;  %v316_v57 = vadd.f32 %v312_v49, %v278_v39 }
  0xb8   : > { %v351_v58 = vadd.f32 %v347_v40, %v313_v54  ;;  %v352_v59 = vadd.f32 %v348_v41, %v314_v55  ;;  %v353_v60 = vadd.f32 %v349_v42, %v315_v56  ;;  %v354_v61 = vadd.f32 %v350_v43, %v316_v57  ;;  %v396_v62 = vpop.permute.xlu1 %395 }
  0xba   : > { %v389_v63 = vadd.f32 %v385_v50, %v351_v58  ;;  %v390_v0 = vadd.f32 %v386_v51, %v352_v59  ;;  %v391_v1 = vadd.f32 %v387_v52, %v353_v60  ;;  %v392_v2 = vadd.f32 %v388_v53, %v354_v61 }
  0xbc   : > { %v398_v3 = vadd.f32 %v396_v62, %v389_v63  ;;  %v399_v4 = vadd.f32 %v396_v62, %v390_v0  ;;  %v400_v5 = vadd.f32 %v396_v62, %v391_v1  ;;  %v401_v6 = vadd.f32 %v396_v62, %v392_v2 }
  0xbe   : > { %v406_v7 = vcombine.low %v398_v3, %v399_v4  ;;  %v407_v8 = vcombine.low %v400_v5, %v401_v6 }
  0xc0   : > { %410 = vst [vmem:[%s232_s18] sm:$0xff] %v406_v7  ;;  %411 = vst [vmem:[%s232_s18 + $0x8] sm:$0xff] %v407_v8 }
  0xc1   : > { %682 = shalt.err (!%p679_p7)
}
  0xc2   : > { %s683_s7 = scalar_lea.hbm %s901_s29, 256  ;;  %s687_s24 = scalar_lea.hbm %s952_s3, 512 }
  0xc3   : > { %p684_p10 = scmp.ne.s32.totalorder %s901_s29, %s683_s7  ;;  %p688_p2 = scmp.lt.s32.totalorder %s901_s29, %s952_s3 }
  0xc4   : > { %p689_p12 = scmp.lt.s32.totalorder %s687_s24, %s683_s7 }
  0xc5   : > { %p685_p4 = pnand %p684_p10, %p832_p9 }
  0xc6   : > { %p690_p8 = por %p689_p12, %p688_p2 }
  0xc7   : > { %p686_p13 = pneg %p685_p4 }
  0xc9   : > { %p691_p0 = pnand %p690_p8, %p686_p13 }
  0xcb   : > { %694 = shalt.err (!%p691_p0)
}
  0xcc   : > { %s759_s18 = smov 128   ;;  %s760_s21 = smov 8  }
  0xcd   : > { %567 = dma.vmem_to_hbm [thread:$0]  (%p832_p9), %s896_s19, 256, %s901_s29, %s413_s30, %s759_s18, %s759_s18, %s760_s21  }
  0xce PF: > { %s443_s22 = sand.u32 1, %s729_s12   ;;  %p958_p1 = scmp.ge.s32.totalorder %s749_s17, 2 }
  0xcf   : > { %s444_s23 = scalar_lea.sflag [#allocation4], %s443_s22 }
  0xd0   : > { %p574_p3 = pnand %p958_p1, %p839_p11 }
  0xd2   : > { %p575_p5 = pneg %p574_p3 }
  0xd4   : > { %724 = dma.done.wait (%p575_p5), %s444_s23, 256  }
  0xd5   : > { %726 = vsyncadd (%p575_p5), %s444_s23, 4294967040  ;;  %s19_s17 = sadd.s32 1, %s749_s17   ;;  %s959_s12 = smov %s733_s13 }
  0xd6   : > { %p16_p6 = scmp.ge.s32.totalorder %s19_s17, 4   ;;  %s960_s13 = smov %s737_s14 }
  0xd7   : > { %s961_s14 = smov %s837_s26  ;;  %s962_s15 = smov %s745_s16 }
  0xd8   : > { %s963_s16 = smov %s965_s20  ;;  %18 = sbr.rel (!%p16_p6) target bundleno = 6 (0x6), region = 90 }
  0xdd   :  { %449 = vsyncpa [#allocation3], 1 }
  0xde   :  { %451 = vsyncpa [#allocation3 + $0x1], 1 }
  0xdf   :  { %452 = vsyncpa [#allocation4], 1 }
  0xe0   :  { %454 = vsyncpa [#allocation4 + $0x1], 1 }

</bundles_post_ra>
